<compile_context>
chip_gen: v5e
topology: v5e:2x2
jax: 0.10.0
libtpu: 0.0.40
codegen_flags: <defaults>
</compile_context>

<pallas_src>
import functools
import math

import numpy as np
import jax
import jax.numpy as jnp
from jax.experimental import pallas as pl
from jax.experimental.pallas import tpu as pltpu

_LN_BASE = math.log(1.01)
_PAD_VALUE = -1.0e4  # far outside every bin -> z < 0 -> contributes exactly 0


def _hist_kernel(cen_ref, x_ref, two_d_ref, one_d_ref, acc_ref, *,
                 width, inv_hw, normalize):
    """One (row-tile, HW-lane-tile) grid step.

    cen_ref:   (1, B, 1) f32  bin centers (input, not a captured constant)
    x_ref:     (R, 1, T)      input rows (n, c) for this tile
    two_d_ref: (R, B, T)      soft bin maps (view of torch.flatten(xx, 2))
    one_d_ref: (R, B, 1)      pooled histogram (block resident across HW axis)
    acc_ref:   (R, B, 1) f32  VMEM scratch accumulator
    """
    t = pl.program_id(1)
    n_t = pl.num_programs(1)

    @pl.when(t == 0)
    def _init():
        acc_ref[...] = jnp.zeros_like(acc_ref)

    # Cast in-kernel so bf16 inputs do not need a wrapper-side astype pass.
    x = x_ref[...].astype(jnp.float32)            # (R, 1, T)
    cen = cen_ref[...]                            # (1, B, 1)

    # bin_centers_conv (w=1, b=-center) -> abs -> bin_widths_conv (w=-1, b=width),
    # vectorized over all channels and bins in one broadcast (no Python loops).
    z = width - jnp.abs(x - cen)                  # (R, B, T)
    # Threshold(1, 0) applied to 1.01**z  <=>  select on z > 0 (power is monotone).
    xx = jnp.where(z > 0.0, jnp.exp(z * _LN_BASE), 0.0)

    two_d_ref[...] = xx.astype(two_d_ref.dtype)               # one full-tile store
    acc_ref[...] += jnp.sum(xx, axis=-1, keepdims=True)       # lane reduce (XLU)

    @pl.when(t == n_t - 1)
    def _finalize():
        if normalize:
            one_d_ref[...] = acc_ref[...] * inv_hw             # mean over true H*W
        else:
            one_d_ref[...] = acc_ref[...]


def _vmem_capacity_bytes():
    """Per-TensorCore VMEM capacity; conservative (v7x) fallback if unknown."""
    try:
        cap = getattr(pltpu.get_tpu_info(), "vmem_capacity_bytes", None)
        if cap:
            return int(cap)
    except Exception:
        pass
    return 64 * 1024 * 1024


def _pick_tiles(N, C, num_bins, HW, tile_budget_bytes, in_itemsize, out_itemsize):
    """Choose (batch tile, lane tile, padded HW extent)."""
    # Row tile: any divisor of N is legal (the leading block dim is unconstrained).
    # Prefer >= 2 blocks on the parallel axis (v7x has 2 TensorCores), then a
    # moderate row-tile size so the (R, B, T) tile spans several sublane groups.
    divisors = [d for d in range(1, N + 1) if N % d == 0]

    def score(tn):
        r = tn * C
        nblk = N // tn
        return (0 if nblk >= 2 else 1,
                0 if 8 <= r <= 64 else 1,
                abs(r - 16))

    tile_n = min(divisors, key=score)
    R = tile_n * C

    # Lane tile from a VMEM budget that accounts for sublane padding of the unit
    # input dim (1 -> 8) and the bin dim (B -> ceil(B/8)*8), double-buffered.
    b_pad = -(-num_bins // 8) * 8
    bytes_per_lane = 2 * (R * 8 * in_itemsize + R * b_pad * out_itemsize)
    max_lanes = max(128, int(tile_budget_bytes // bytes_per_lane))
    max_lanes = max(128, (max_lanes // 128) * 128)

    if HW % 128 == 0:
        for cand in range(min(HW, max_lanes), 0, -128):
            if HW % cand == 0:
                return tile_n, cand, HW
    if HW <= max_lanes:
        return tile_n, HW, HW                      # small, full-extent lane block
    # Large, non-128-divisible HW: pad up to a multiple of an affordable lane tile.
    t = max(128, min(max_lanes, 8192))
    hw_pad = -(-HW // t) * t
    return tile_n, t, hw_pad


def hist_layer_forward(x, centers, width, num_bins, normalize=True,
                       tile_n=None, tile_hw=None,
                       two_d_dtype=jnp.float32,
                       vmem_tile_budget_bytes=None):
    """Pallas forward of HistLayer.  x: (N, C, H, W).  Returns (one_d, two_d)."""
    N, C, H, W = x.shape
    HW = H * W
    CB = C * num_bins
    NC = N * C

    centers_np = np.asarray(centers, dtype=np.float32).reshape(-1)
    assert centers_np.shape[0] == num_bins
    # The same centers serve every channel (grouped-conv intent).
    cen_in = jnp.asarray(centers_np).reshape(1, num_bins, 1)

    # (N, C, H, W) -> (N*C, 1, HW): dense rows over (n, c); the middle unit dim
    # lets the kernel broadcast against (1, B, 1) with no in-kernel reshapes.
    if jnp.issubdtype(x.dtype, jnp.floating):
        xf = x.reshape(NC, 1, HW)                  # cast happens inside the kernel
    else:
        xf = x.reshape(NC, 1, HW).astype(jnp.float32)

    # Per-generation VMEM budgeting (v7x: 64 MiB physical; v5e/v6e: 128 MiB).
    vmem_cap = _vmem_capacity_bytes()
    vmem_limit = min(vmem_cap * 3 // 4, 100 * 1024 * 1024)
    budget = (vmem_limit * 2 // 3 if vmem_tile_budget_bytes is None
              else int(vmem_tile_budget_bytes))

    auto_tn, auto_thw, hw_pad = _pick_tiles(
        N, C, num_bins, HW, budget,
        in_itemsize=xf.dtype.itemsize,
        out_itemsize=jnp.dtype(two_d_dtype).itemsize)
    tile_n = auto_tn if tile_n is None else int(tile_n)
    if tile_hw is None:
        tile_hw = auto_thw
    else:
        tile_hw = int(tile_hw)
        hw_pad = -(-HW // tile_hw) * tile_hw
    assert N % tile_n == 0 and hw_pad % tile_hw == 0

    if hw_pad != HW:
        # TODO(synk): a cdiv grid with an in-kernel lane mask would avoid both the
        # pad copy here and the final slice copy for HW not divisible by the tile.
        xf = jnp.pad(xf, ((0, 0), (0, 0), (0, hw_pad - HW)),
                     constant_values=_PAD_VALUE)

    R = tile_n * C
    kernel = functools.partial(
        _hist_kernel, width=float(width), inv_hw=1.0 / float(HW),
        normalize=bool(normalize))

    # NOTE(v5e): with 128 MiB VMEM, `pipeline_mode=pl.Buffered(3)` on the two_d
    # out spec can further smooth writeback jitter; omitted for portability.
    two_d, one_d = pl.pallas_call(
        kernel,
        out_shape=(
            jax.ShapeDtypeStruct((NC, num_bins, hw_pad), two_d_dtype),
            jax.ShapeDtypeStruct((NC, num_bins, 1), jnp.float32),
        ),
        grid_spec=pltpu.PrefetchScalarGridSpec(
            num_scalar_prefetch=0,
            grid=(N // tile_n, hw_pad // tile_hw),
            in_specs=[
                pl.BlockSpec((1, num_bins, 1), lambda n, t: (0, 0, 0)),
                pl.BlockSpec((R, 1, tile_hw), lambda n, t: (n, 0, t)),
            ],
            out_specs=[
                pl.BlockSpec((R, num_bins, tile_hw), lambda n, t: (n, 0, t)),
                pl.BlockSpec((R, num_bins, 1), lambda n, t: (n, 0, 0)),
            ],
            scratch_shapes=[pltpu.VMEM((R, num_bins, 1), jnp.float32)],
        ),
        compiler_params=pltpu.CompilerParams(
            dimension_semantics=("parallel", "arbitrary"),
            vmem_limit_bytes=int(vmem_limit)),
    )(cen_in, xf)

    two_d = two_d.reshape(N, CB, hw_pad)
    if hw_pad != HW:
        two_d = two_d[:, :, :HW]   # extra copy; only taken on the padded fallback
    one_d = one_d.reshape(N, CB)
    return one_d, two_d


def hist_layer_reference(x, centers, width, num_bins, normalize=True):
    """Pure-JAX reference reproducing the PyTorch forward (for validation).

    Uses the algebraically identical `z > 0` form of Threshold(1,0) on 1.01**z so
    the predicate is evaluated on exactly the same quantity as the kernel.
    """
    N, C, H, W = x.shape
    cen = jnp.asarray(centers, jnp.float32).reshape(1, 1, num_bins, 1, 1)
    z = width - jnp.abs(x[:, :, None, :, :].astype(jnp.float32) - cen)
    xx = jnp.where(z > 0.0, jnp.exp(z * _LN_BASE), 0.0)
    xx = xx.reshape(N, C * num_bins, H, W)
    two_d = xx.reshape(N, C * num_bins, H * W)
    one_d = jnp.mean(xx, axis=(2, 3)) if normalize else jnp.sum(xx, axis=(2, 3))
    return one_d, two_d


if __name__ == "__main__":
    # "Parameters" exactly as in HistLayer.__init__
    num_bins = 4
    bin_edges = np.linspace(-0.05, 1.05, num_bins + 1)
    centers = (bin_edges + (bin_edges[2] - bin_edges[1]) / 2)[:-1]
    width = (bin_edges[2] - bin_edges[1]) / 2

    k1, k2 = jax.random.split(jax.random.PRNGKey(0))

    # Case 1: the case the PyTorch module actually supports (in_channels == 1).
    x1 = jax.random.uniform(k1, (2, 1, 32, 32), dtype=jnp.float32)
    one_d, two_d = hist_layer_forward(x1, centers, width, num_bins, normalize=True)
    jax.block_until_ready((one_d, two_d))
    one_d_r, two_d_r = hist_layer_reference(x1, centers, width, num_bins, True)
    assert one_d.shape == (2, num_bins)
    assert two_d.shape == (2, num_bins, 32 * 32)
    np.testing.assert_allclose(np.asarray(two_d), np.asarray(two_d_r),
                               rtol=1e-5, atol=1e-6)
    np.testing.assert_allclose(np.asarray(one_d), np.asarray(one_d_r),
                               rtol=1e-4, atol=1e-4)

    # Case 2: force HW tiling (4 lane tiles) to exercise the accumulator
    # init / accumulate / finalize path that large images take.
    one_d_t, two_d_t = hist_layer_forward(x1, centers, width, num_bins,
                                          normalize=True, tile_n=1, tile_hw=256)
    jax.block_until_ready((one_d_t, two_d_t))
    np.testing.assert_allclose(np.asarray(two_d_t), np.asarray(two_d_r),
                               rtol=1e-5, atol=1e-6)
    np.testing.assert_allclose(np.asarray(one_d_t), np.asarray(one_d_r),
                               rtol=1e-4, atol=1e-4)

    # Case 3: normalize=False (sum pooling) and the C > 1 generalization
    # (per-channel tiled centers, the grouped-conv intent of the module).
    x2 = jax.random.uniform(k2, (2, 2, 16, 16), dtype=jnp.float32)
    one_d2, two_d2 = hist_layer_forward(x2, centers, width, num_bins,
                                        normalize=False)
    jax.block_until_ready((one_d2, two_d2))
    one_d2_r, two_d2_r = hist_layer_reference(x2, centers, width, num_bins, False)
    np.testing.assert_allclose(np.asarray(two_d2), np.asarray(two_d2_r),
                               rtol=1e-5, atol=1e-6)
    np.testing.assert_allclose(np.asarray(one_d2), np.asarray(one_d2_r),
                               rtol=1e-4, atol=1e-3)

    print("KERNEL_OK")
</pallas_src>

<mosaic_0001>
module attributes {stable_mosaic.version = 11 : i64} {
  func.func @_hist_kernel(%arg0: i32, %arg1: i32, %arg2: memref<1x4x1xf32, #tpu.memory_space<vmem>>, %arg3: memref<1x1x1024xf32, #tpu.memory_space<vmem>>, %arg4: memref<1x4x1024xf32, #tpu.memory_space<vmem>>, %arg5: memref<1x4x1xf32, #tpu.memory_space<vmem>>, %arg6: memref<1x4x1xf32, #tpu.memory_space<vmem>>) attributes {dimension_semantics = [#tpu.dimension_semantics<parallel>, #tpu.dimension_semantics<arbitrary>], iteration_bounds = array<i64: 2, 1>, scalar_prefetch = 0 : i64, scratch_operands = 1 : i64, tpu.core_type = #tpu.core_type<tc>, window_params = [{pipeline_mode = #tpu.pipeline_mode<synchronous>, transform_indices = @transform_0, window_bounds = array<i64: 1, 4, 1>}, {transform_indices = @transform_1, window_bounds = array<i64: 1, 1, 1024>}, {transform_indices = @transform_2, window_bounds = array<i64: 1, 4, 1024>}, {transform_indices = @transform_3, window_bounds = array<i64: 1, 4, 1>}]} {
    %c0_i32 = arith.constant 0 : i32
    %0 = arith.cmpi eq, %arg1, %c0_i32 : i32
    %1 = arith.extui %0 : i1 to i32
    %c0_i32_0 = arith.constant 0 : i32
    %2 = arith.cmpi ne, %1, %c0_i32_0 : i32
    scf.if %2 {
      %cst_21 = arith.constant 0.000000e+00 : f32
      %27 = vector.broadcast %cst_21 : f32 to vector<1x4x1xf32>
      %c0_22 = arith.constant 0 : index
      %c0_23 = arith.constant 0 : index
      %c0_24 = arith.constant 0 : index
      %28 = vector.load %arg6[%c0_22, %c0_23, %c0_24] : memref<1x4x1xf32, #tpu.memory_space<vmem>>, vector<1x4x1xf32>
      tpu.vector_store %arg6[%c0_22, %c0_23, %c0_24], %27 {strides = array<i32>} : memref<1x4x1xf32, #tpu.memory_space<vmem>>, vector<1x4x1xf32>,
    } else {
    }
    %c0 = arith.constant 0 : index
    %c0_1 = arith.constant 0 : index
    %c0_2 = arith.constant 0 : index
    %3 = vector.load %arg3[%c0, %c0_1, %c0_2] : memref<1x1x1024xf32, #tpu.memory_space<vmem>>, vector<1x1x1024xf32>
    %c0_3 = arith.constant 0 : index
    %c0_4 = arith.constant 0 : index
    %c0_5 = arith.constant 0 : index
    %4 = vector.load %arg2[%c0_3, %c0_4, %c0_5] : memref<1x4x1xf32, #tpu.memory_space<vmem>>, vector<1x4x1xf32>
    %5 = vector.broadcast %3 : vector<1x1x1024xf32> to vector<1x4x1024xf32>
    %6 = vector.broadcast %4 : vector<1x4x1xf32> to vector<1x4x1024xf32>
    %7 = arith.subf %5, %6 : vector<1x4x1024xf32>
    %8 = math.absf %7 : vector<1x4x1024xf32>
    %cst = arith.constant 1.375000e-01 : f32
    %9 = vector.broadcast %cst : f32 to vector<1x4x1024xf32>
    %10 = arith.subf %9, %8 : vector<1x4x1024xf32>
    %cst_6 = arith.constant 0.000000e+00 : f32
    %11 = vector.broadcast %cst_6 : f32 to vector<1x4x1024xf32>
    %12 = arith.cmpf ogt, %10, %11 : vector<1x4x1024xf32>
    %cst_7 = arith.constant 0.00995033048 : f32
    %13 = vector.broadcast %cst_7 : f32 to vector<1x4x1024xf32>
    %14 = arith.mulf %10, %13 : vector<1x4x1024xf32>
    %15 = math.exp %14 : vector<1x4x1024xf32>
    %cst_8 = arith.constant 0.000000e+00 : f32
    %16 = vector.broadcast %cst_8 : f32 to vector<1x4x1024xf32>
    %17 = arith.select %12, %15, %16 : vector<1x4x1024xi1>, vector<1x4x1024xf32>
    %c0_9 = arith.constant 0 : index
    %c0_10 = arith.constant 0 : index
    %c0_11 = arith.constant 0 : index
    %18 = vector.load %arg4[%c0_9, %c0_10, %c0_11] : memref<1x4x1024xf32, #tpu.memory_space<vmem>>, vector<1x4x1024xf32>
    tpu.vector_store %arg4[%c0_9, %c0_10, %c0_11], %17 {strides = array<i32>} : memref<1x4x1024xf32, #tpu.memory_space<vmem>>, vector<1x4x1024xf32>,
    %c0_12 = arith.constant 0 : index
    %c0_13 = arith.constant 0 : index
    %c0_14 = arith.constant 0 : index
    %19 = vector.load %arg6[%c0_12, %c0_13, %c0_14] : memref<1x4x1xf32, #tpu.memory_space<vmem>>, vector<1x4x1xf32>
    %cst_15 = arith.constant dense<0.000000e+00> : vector<1x4xf32>
    %20 = vector.multi_reduction <add>, %17, %cst_15 [2] : vector<1x4x1024xf32> to vector<1x4xf32>
    %21 = vector.shape_cast %20 : vector<1x4xf32> to vector<1x4x1xf32>
    %22 = arith.addf %19, %21 : vector<1x4x1xf32>
    %c0_16 = arith.constant 0 : index
    %c0_17 = arith.constant 0 : index
    %c0_18 = arith.constant 0 : index
    %23 = vector.load %arg6[%c0_16, %c0_17, %c0_18] : memref<1x4x1xf32, #tpu.memory_space<vmem>>, vector<1x4x1xf32>
    tpu.vector_store %arg6[%c0_16, %c0_17, %c0_18], %22 {strides = array<i32>} : memref<1x4x1xf32, #tpu.memory_space<vmem>>, vector<1x4x1xf32>,
    %c0_i32_19 = arith.constant 0 : i32
    %24 = arith.cmpi eq, %arg1, %c0_i32_19 : i32
    %25 = arith.extui %24 : i1 to i32
    %c0_i32_20 = arith.constant 0 : i32
    %26 = arith.cmpi ne, %25, %c0_i32_20 : i32
    scf.if %26 {
      %c0_21 = arith.constant 0 : index
      %c0_22 = arith.constant 0 : index
      %c0_23 = arith.constant 0 : index
      %27 = vector.load %arg6[%c0_21, %c0_22, %c0_23] : memref<1x4x1xf32, #tpu.memory_space<vmem>>, vector<1x4x1xf32>
      %cst_24 = arith.constant 9.765625E-4 : f32
      %28 = vector.broadcast %cst_24 : f32 to vector<1x4x1xf32>
      %29 = arith.mulf %27, %28 : vector<1x4x1xf32>
      %c0_25 = arith.constant 0 : index
      %c0_26 = arith.constant 0 : index
      %c0_27 = arith.constant 0 : index
      %30 = vector.load %arg5[%c0_25, %c0_26, %c0_27] : memref<1x4x1xf32, #tpu.memory_space<vmem>>, vector<1x4x1xf32>
      tpu.vector_store %arg5[%c0_25, %c0_26, %c0_27], %29 {strides = array<i32>} : memref<1x4x1xf32, #tpu.memory_space<vmem>>, vector<1x4x1xf32>,
    } else {
    }
    return
  }
  func.func @transform_0(%arg0: i32, %arg1: i32) -> (i32, i32, i32) {
    %c0_i32 = arith.constant 0 : i32
    %c0_i32_0 = arith.constant 0 : i32
    %c0_i32_1 = arith.constant 0 : i32
    %c0_i32_2 = arith.constant 0 : i32
    return %c0_i32, %c0_i32_0, %c0_i32_1 : i32, i32, i32
  }
  func.func @transform_1(%arg0: i32, %arg1: i32) -> (i32, i32, i32) {
    %c0_i32 = arith.constant 0 : i32
    %c0_i32_0 = arith.constant 0 : i32
    return %arg0, %c0_i32, %arg1 : i32, i32, i32
  }
  func.func @transform_2(%arg0: i32, %arg1: i32) -> (i32, i32, i32) {
    %c0_i32 = arith.constant 0 : i32
    %c0_i32_0 = arith.constant 0 : i32
    return %arg0, %c0_i32, %arg1 : i32, i32, i32
  }
  func.func @transform_3(%arg0: i32, %arg1: i32) -> (i32, i32, i32) {
    %c0_i32 = arith.constant 0 : i32
    %c0_i32_0 = arith.constant 0 : i32
    %c0_i32_1 = arith.constant 0 : i32
    return %arg0, %c0_i32, %c0_i32_0 : i32, i32, i32
  }
}

</mosaic_0001>

<bundles_post_ra>
// kernel: tpu_custom_call.1
= control target key start
LH: loop header
LB: loop body
LE: loop exit
PB: predicated region body
PF: predicated region fallthrough
CT: control target
= control target key end

     0   :  { %9 = vsyncpa [#allocation4], 0  ;;  %s890_s0 = inlined_call_operand.vmem [shape: f32[1,4,1], index: 0, kind: input, shape index: {}]   ;;  %s891_s1 = inlined_call_operand.hbm [shape: f32[2,1,1024], index: 1, kind: input, shape index: {}]   ;;  %s892_s2 = inlined_call_operand.hbm [shape: f32[2,4,1024], index: 2, kind: output, shape index: {0}]   ;;  %s893_s3 = inlined_call_operand.vmem [shape: f32[2,4,1], index: 3, kind: output, shape index: {1}]  }
   0x1   :  { %11 = vsyncpa [#allocation4 + $0x1], 0 }
   0x2   :  { %12 = vsyncpa [#allocation5], 0 }
   0x3   :  { %14 = vsyncpa [#allocation5 + $0x1], 0  ;;  %s731_s12 = smov 0   ;;  %s733_s13 = smov 0  }
   0x4   :  { %s735_s14 = smov 0   ;;  %s737_s15 = smov 0  }
   0x5   :  { %s739_s16 = smov 0   ;;  %s741_s17 = smov 0  }
   0x6 LB: > { %s498_s18 = sadd.s32 4294967295, %s707_s17   ;;  %s499_s19 = sadd.s32 4294967294, %s707_s17   ;;  %s707_s17 = sphi %s741_s17, %s20_s17   ;;  %s703_s16 = sphi %s739_s16, %s902_s16   ;;  %s699_s15 = sphi %s737_s15, %s901_s15   ;;  %s695_s14 = sphi %s735_s14, %s900_s14   ;;  %s691_s13 = sphi %s733_s13, %s899_s13   ;;  %s687_s12 = sphi %s731_s12, %s898_s12  }
   0x7   : > { %s32_s20 = sadd.s32 1, %s703_s16  ;;  %s62_s21 = sadd.s32 1, %s695_s14 }
   0x8   : > { %p34_p0 = scmp.ge.s32.totalorder %s32_s20, 2  ;;  %p69_p1 = scmp.ne.s32.totalorder %s695_s14, %s691_s13 }
   0x9   : > { %p70_p2 = scmp.eq.s32.totalorder %s707_s17, 0  ;;  %p75_p3 = scmp.ne.s32.totalorder %s691_s13, %s687_s12 }
   0xa   : > { %s904_s20 = smov (%p34_p0, %s32_s20), 0  ;;  %p76_p5 = scmp.eq.s32.totalorder %s498_s18, 0 }
   0xb   : > { %p772_p4 = por %p70_p2, %p69_p1  ;;  %s57_s23 = ssub.s32 %s703_s16, %s904_s20 }
   0xc   : > { %p101_p6 = scmp.eq.s32.totalorder %s498_s18, 1  ;;  %p60_p7 = scmp.eq.s32.totalorder %s57_s23, 0 }
   0xd   : > { %p778_p8 = por %p76_p5, %p75_p3  ;;  %p107_p10 = scmp.eq.s32.totalorder %s499_s19, 1 }
   0xe   : > { %p782_p9 = por %p101_p6, %p69_p1  ;;  %p501_p12 = scmp.ge.s32.totalorder %s707_s17, 2 }
   0xf   : > { %s787_s26 = scalar_select %p60_p7, %s695_s14, %s62_s21  }
  0x10   : > { %p789_p11 = por %p107_p10, %p75_p3  ;;  %p526_p13 = scmp.lt.s32.totalorder %s707_s17, 2 }
  0x11   : > { %s156_s28 = sand.u32 1, %s695_s14   ;;  %s503_s30 = sshll.u32 %s703_s16, 3 }
  0x12   : > { %s502_s29 = sshll.u32 %s156_s28, 3  ;;  %s166_s6 = scalar_lea.hbm %s891_s1, %s503_s30 }
  0x13   : > { %s160_s7 = scalar_lea.vmem [#allocation3], %s502_s29  ;;  %s168_s9 = sshll.u32 %s166_s6, 4  ;;  %s169_s9 = int_to_ptr.hbm [resolvable:$true] %s168_s9 }
  0x14   : > { %s170_s8 = sshll.u32 %s160_s7, 4  ;;  %p519_p0 = pnand %p526_p13, %p772_p4  ;;  %s171_s8 = int_to_ptr.vmem [resolvable:$true] %s170_s8 }
  0x15   : > { %p504_p1 = scmp.ge.s32.totalorder %s707_s17, 1  ;;  %p175_p2 = scmp.lt.s32.totalorder %s707_s17, 3 }
  0x16   : > { %s157_s10 = scalar_lea.sflag [#allocation4], %s156_s28 }
  0x17   : > { %521 = dma.hbm_to_vmem [thread:$0]  (!%p519_p0), %s169_s9, 128, %s171_s8, %s157_s10  }
  0x18   : > { %p176_p3 = pnand %p504_p1, %p175_p2 }
  0x19   : > { %s805_s11 = sand.u32 (!%p176_p3), 1, %s691_s13  }
  0x1a   : > { %179 = sbr.rel (%p176_p3) target bundleno = 313 (0x139), region = 28  ;;  %s505_s18 = sshll.u32 (!%p176_p3), %s805_s11, 3 }
  0x1b   : > { %s182_s19 = scalar_lea.sflag (!%p176_p3), [#allocation4], %s805_s11  ;;  %s185_s21 = scalar_lea.vmem (!%p176_p3), [#allocation3], %s505_s18 }
  0x1f   : > { %678 = dma.done.wait (%p778_p8), %s182_s19, 128  }
  0x20   : > { %680 = vsyncadd (%p778_p8), %s182_s19, 4294967168  ;;  %v709_v0 = vmov 0   ;;  %v226_v1 = vld [vmem:[%s890_s0] sm:$0xf]  ;;  %v225_v2 = vld [vmem:[%s185_s21] sm:$0xff]  ;;  %vm223_vm0 = vcmask 3072  }
  0x21   : > { %578 = vset.pattern.permute.xlu0 %v709_v0  ;;  %v228_v3 = vperm.slane %v225_v2, 0  ;;  %v229_v4 = vperm.slane %v225_v2, 1  ;;  %v230_v5 = vperm.slane %v225_v2, 2  ;;  %v231_v6 = vperm.slane %v225_v2, 3  ;;  %s506_s24 = sshll.u32 %s805_s11, 5  ;;  %s513_s29 = sshll.u32 %s699_s15, 5 }
  0x22   : > { %246 = vperm.xlu0 %578, %v226_v1   ;;  %v232_v7 = vperm.slane %v225_v2, 4  ;;  %v233_v8 = vperm.slane %v225_v2, 5  ;;  %v234_v9 = vperm.slane %v225_v2, 6  ;;  %v235_v10 = vperm.slane %v225_v2, 7  ;;  %s828_s28 = scalar_lea.vmem [#allocation6], %s506_s24  ;;  %s383_s5 = scalar_lea.hbm %s892_s2, %s513_s29 }
  0x23   : > { %v710_v50 = vmov 0.0   ;;  %vm325_vm1 = vcmask 1043456   ;;  %s385_s6 = sshll.u32 %s828_s28, 4  ;;  %s387_s7 = sshll.u32 %s383_s5, 4  ;;  %s386_s6 = int_to_ptr.vmem [resolvable:$true] %s385_s6  ;;  %s388_s7 = int_to_ptr.hbm [resolvable:$true] %s387_s7 }
  0x24   : > { %224 = vst.msk [vmem:[#allocation2] sm:$0xf] %vm223_vm0, %v710_v50  ;;  %s366_s8 = scalar_lea.sflag [#allocation5], %s805_s11  ;;  %s639_s9 = sshra.s32 %s388_s7, 4  ;;  %s640_s9 = int_to_ptr.hbm [resolvable:$true] %s639_s9 }
  0x25   : > { %s641_s10 = scalar_lea.hbm %s640_s9, 32  ;;  %s645_s21 = scalar_lea.hbm %s892_s2, 64 }
  0x26   : > { %p642_p4 = scmp.ne.s32.totalorder %s640_s9, %s641_s10  ;;  %p646_p7 = scmp.lt.s32.totalorder %s640_s9, %s892_s2 }
  0x27   : > { %p647_p8 = scmp.lt.s32.totalorder %s645_s21, %s641_s10 }
  0x28   : > { %p643_p5 = pnand %p642_p4, %p782_p9 }
  0x29   : > { %p648_p10 = por %p647_p8, %p646_p7 }
  0x2a   : > { %p644_p6 = pneg %p643_p5 }
  0x2c   : > { %p649_p13 = pnand %p648_p10, %p644_p6 }
  0x94   : > { %v247_v11 = vpop.permute.xlu0 %246 }
  0x95   : > { %v249_v12 = vsub.f32 %v228_v3, %v247_v11  ;;  %v250_v13 = vsub.f32 %v229_v4, %v247_v11  ;;  %v251_v14 = vsub.f32 %v230_v5, %v247_v11  ;;  %v252_v15 = vsub.f32 %v231_v6, %v247_v11 }
  0x96   : > { %v253_v16 = vsub.f32 %v232_v7, %v247_v11  ;;  %v254_v17 = vsub.f32 %v233_v8, %v247_v11  ;;  %v255_v18 = vsub.f32 %v234_v9, %v247_v11  ;;  %v256_v19 = vsub.f32 %v235_v10, %v247_v11 }
  0x97   : > { %v257_v20 = vand.u32 2147483647, %v249_v12  ;;  %v258_v21 = vand.u32 2147483647, %v250_v13  ;;  %v259_v22 = vand.u32 2147483647, %v251_v14 }
  0x98   : > { %v260_v23 = vand.u32 2147483647, %v252_v15  ;;  %v261_v24 = vand.u32 2147483647, %v253_v16  ;;  %v262_v25 = vand.u32 2147483647, %v254_v17 }
  0x99   : > { %v263_v26 = vand.u32 2147483647, %v255_v18  ;;  %v264_v27 = vand.u32 2147483647, %v256_v19  ;;  %v265_v28 = vsub.f32 0.1375, %v257_v20 }
  0x9a   : > { %v266_v29 = vsub.f32 0.1375, %v258_v21  ;;  %v267_v30 = vsub.f32 0.1375, %v259_v22  ;;  %v268_v31 = vsub.f32 0.1375, %v260_v23 }
  0x9b   : > { %v269_v32 = vsub.f32 0.1375, %v261_v24  ;;  %v270_v33 = vsub.f32 0.1375, %v262_v25  ;;  %v816_v34 = vsub.f32 0.1375, %v263_v26 }
  0x9c   : > { %v818_v35 = vsub.f32 0.1375, %v264_v27  ;;  %v281_v36 = vmul.f32 0.0099503305, %v265_v28  ;;  %v282_v37 = vmul.f32 0.0099503305, %v266_v29 }
  0x9d   : > { %v283_v38 = vmul.f32 0.0099503305, %v267_v30  ;;  %v284_v39 = vmul.f32 0.0099503305, %v268_v31  ;;  %v285_v40 = vmul.f32 0.0099503305, %v269_v32 }
  0x9e   : > { %v286_v41 = vmul.f32 0.0099503305, %v270_v33  ;;  %v287_v42 = vmul.f32 0.0099503305, %v816_v34  ;;  %v289_v43 = vmul.f32 1.442695, %v281_v36 }
  0x9f   : > { %v291_v44 = vmul.f32 1.442695, %v282_v37  ;;  %v293_v45 = vmul.f32 1.442695, %v283_v38  ;;  %v288_v46 = vmul.f32 0.0099503305, %v818_v35 }
  0xa0   : > { %v295_v47 = vmul.f32 1.442695, %v284_v39  ;;  %579 = vpow2.f32 %v289_v43  ;;  %v297_v48 = vmul.f32 1.442695, %v285_v40  ;;  %v299_v49 = vmul.f32 1.442695, %v286_v41 }
  0xa1   : > { %581 = vpow2.f32 %v291_v44  ;;  %v301_v51 = vmul.f32 1.442695, %v287_v42  ;;  %v303_v52 = vmul.f32 1.442695, %v288_v46  ;;  %vm273_vm2 = vcmp.gt.f32.partialorder %v265_v28, 0.0 }
  0xa2   : > { %583 = vpow2.f32 %v293_v45  ;;  %vm274_vm3 = vcmp.gt.f32.partialorder %v266_v29, 0.0  ;;  %vm275_vm4 = vcmp.gt.f32.partialorder %v267_v30, 0.0  ;;  %vm276_vm5 = vcmp.gt.f32.partialorder %v268_v31, 0.0 }
  0xa3   : > { %585 = vpow2.f32 %v295_v47  ;;  %vm277_vm6 = vcmp.gt.f32.partialorder %v269_v32, 0.0  ;;  %vm278_vm7 = vcmp.gt.f32.partialorder %v270_v33, 0.0  ;;  %vm280_vm8 = vcmp.gt.f32.partialorder %v818_v35, 0.0 }
  0xa4   : > { %587 = vpow2.f32 %v297_v48  ;;  %vm279_vm9 = vcmp.gt.f32.partialorder %v816_v34, 0.0 }
  0xa5   : > { %589 = vpow2.f32 %v299_v49 }
  0xa6   : > { %v580_v53 = vpop.eup %579  ;;  %591 = vpow2.f32 %v301_v51 }
  0xa7   : > { %v582_v54 = vpop.eup %581  ;;  %593 = vpow2.f32 %v303_v52  ;;  %v305_v55 = vsel %vm273_vm2, %v580_v53, 0.0 }
  0xa8   : > { %v584_v56 = vpop.eup %583  ;;  %v306_v57 = vsel %vm274_vm3, %v582_v54, 0.0  ;;  %v339_v58 = vsel %vm325_vm1, %v305_v55, 0.0 }
  0xa9   : > { %v586_v59 = vpop.eup %585  ;;  %v307_v60 = vsel %vm275_vm4, %v584_v56, 0.0  ;;  %v321_v61 = vrot.slane %v306_v57, 4  ;;  %v340_v62 = vsel %vm325_vm1, %v306_v57, 0.0 }
  0xaa   : > { %v588_v63 = vpop.eup %587  ;;  %v308_v0 = vsel %vm276_vm5, %v586_v59, 0.0  ;;  %v341_v1 = vadd.f32 %v340_v62, %v339_v58  ;;  %v342_v4 = vsel %vm325_vm1, %v307_v60, 0.0 }
  0xab   : > { %v590_v2 = vpop.eup %589  ;;  %v322_v3 = vrot.slane %v308_v0, 4  ;;  %v326_v5 = vsel %vm325_vm1, %v305_v55, %v321_v61  ;;  %v309_v7 = vsel %vm277_vm6, %v588_v63, 0.0  ;;  %v344_v13 = vsel %vm325_vm1, %v308_v0, 0.0 }
  0xac   : > { %v592_v6 = vpop.eup %591  ;;  %v310_v8 = vsel %vm278_vm7, %v590_v2, 0.0  ;;  %v343_v9 = vadd.f32 %v342_v4, %v341_v1  ;;  %334 = vst [vmem:[%s828_s28] sm:$0xff] %v326_v5  ;;  %v346_v18 = vsel %vm325_vm1, %v309_v7, 0.0 }
  0xad   : > { %v594_v10 = vpop.eup %593  ;;  %v323_v11 = vrot.slane %v310_v8, 4  ;;  %v327_v12 = vsel %vm325_vm1, %v307_v60, %v322_v3  ;;  %v311_v19 = vsel %vm279_vm9, %v592_v6, 0.0  ;;  %v348_v22 = vsel %vm325_vm1, %v310_v8, 0.0 }
  0xae   : > { %v312_v14 = vsel %vm280_vm8, %v594_v10, 0.0  ;;  %v345_v15 = vadd.f32 %v344_v13, %v343_v9  ;;  %335 = vst [vmem:[%s828_s28 + $0x8] sm:$0xff] %v327_v12  ;;  %v350_v24 = vsel %vm325_vm1, %v311_v19, 0.0 }
  0xaf   : > { %v324_v16 = vrot.slane %v312_v14, 4  ;;  %v328_v17 = vsel %vm325_vm1, %v309_v7, %v323_v11  ;;  %v352_v26 = vsel %vm325_vm1, %v312_v14, 0.0 }
  0xb0   : > { %336 = vst [vmem:[%s828_s28 + $0x10] sm:$0xff] %v328_v17  ;;  %v347_v20 = vadd.f32 %v346_v18, %v345_v15 }
  0xb1   : > { %v329_v21 = vsel %vm325_vm1, %v311_v19, %v324_v16 }
  0xb2   : > { %337 = vst [vmem:[%s828_s28 + $0x18] sm:$0xff] %v329_v21  ;;  %v349_v23 = vadd.f32 %v348_v22, %v347_v20 }
  0xb4   : > { %v351_v25 = vadd.f32 %v350_v24, %v349_v23 }
  0xb6   : > { %v353_v27 = vadd.f32 %v352_v26, %v351_v25 }
  0xb8   : > { %354 = vadd.xlane.f32.xlu0 %v353_v27 }
  0xb9   : > { %652 = shalt.err (!%p649_p13)
}
  0xba   : > { %516 = dma.vmem_to_hbm [thread:$0]  (%p782_p9), %s386_s6, 512, %s388_s7, %s366_s8   ;;  %v338_v28 = vld [vmem:[#allocation2] sm:$0xf] }
  0xbb   : > { %p215_p0 = scmp.lt.s32.totalorder %s699_s15, 1 }
  0xbd   : > { %s906_s15 = smov (!%p215_p0, %s699_s15), 1 }
  0xbe   : > { %s507_s11 = sshll.u32 %s906_s15, 2 }
  0xbf   : > { %s218_s29 = scalar_lea.vmem %s893_s3, %s507_s11 }
 0x12b   : > { %v355_v29 = vpop.xlane.xlu0 %354 }
 0x12c   : > { %v356_v30 = vadd.f32 %v355_v29, %v338_v28 }
 0x12e   : > { %358 = vst.msk [vmem:[#allocation2] sm:$0xf] %vm223_vm0, %v356_v30 }
 0x135   : > { %v362_v31 = vld [vmem:[#allocation2] sm:$0xf] }
 0x136   : > { %v363_v32 = vmul.f32 0.0009765625, %v362_v31 }
 0x138   : > { %364 = vst.msk [vmem:[%s218_s29] sm:$0xf] %vm223_vm0, %v363_v32 }
 0x139 PF: > { %s402_s25 = sand.u32 1, %s687_s12   ;;  %p523_p9 = pnand %p501_p12, %p789_p11 }
 0x13a   : > { %s403_s30 = scalar_lea.sflag [#allocation5], %s402_s25 }
 0x13b   : > { %p524_p1 = pneg %p523_p9 }
 0x13d   : > { %682 = dma.done.wait (%p524_p1), %s403_s30, 512  }
 0x13e   : > { %684 = vsyncadd (%p524_p1), %s403_s30, 4294966784  ;;  %s20_s17 = sadd.s32 1, %s707_s17   ;;  %s898_s12 = smov %s691_s13 }
 0x13f   : > { %p17_p2 = scmp.ge.s32.totalorder %s20_s17, 4   ;;  %s899_s13 = smov %s695_s14 }
 0x140   : > { %s900_s14 = smov %s787_s26  ;;  %s901_s15 = smov %s703_s16 }
 0x141   : > { %s902_s16 = smov %s904_s20  ;;  %19 = sbr.rel (!%p17_p2) target bundleno = 6 (0x6), region = 93 }
 0x146   :  { %416 = vsyncpa [#allocation4], 1 }
 0x147   :  { %418 = vsyncpa [#allocation4 + $0x1], 1 }
 0x148   :  { %419 = vsyncpa [#allocation5], 1 }
 0x149   :  { %421 = vsyncpa [#allocation5 + $0x1], 1 }

</bundles_post_ra>
